<compile_context>
chip_gen: v5e
topology: v5e:2x2
jax: 0.10.0
libtpu: 0.0.40
codegen_flags: <defaults>
</compile_context>

<pallas_src>
import jax
import jax.numpy as jnp
from jax.experimental import pallas as pl
from jax.experimental.pallas import tpu as pltpu


# Target bytes per DMA chunk and maximum number of outstanding DMAs
# (one DMA semaphore per chunk).  Chunks live in HBM only, so there is no
# per-generation VMEM budget to tune.
_TARGET_CHUNK_BYTES = 32 * 1024 * 1024
_MAX_CHUNKS = 8


def _make_dma_copy_kernel(chunks):
    """Build a kernel issuing one HBM->HBM DMA per (row_start, row_count) chunk.

    `chunks` is a list of static Python int pairs, so the kernel body unrolls
    into a fixed set of DMA descriptors: all .start() first (overlapped,
    multiple DMAs in flight), then all .wait().
    """

    def kernel(x_hbm, o_hbm, sems):
        copies = []
        for i, (r0, nr) in enumerate(chunks):
            cp = pltpu.make_async_copy(
                x_hbm.at[pl.ds(r0, nr), :],
                o_hbm.at[pl.ds(r0, nr), :],
                sems.at[i],
            )
            cp.start()
            copies.append(cp)
        for cp in copies:
            cp.wait()

    return kernel


def _pallas_identity_copy(x):
    """Chunked HBM->HBM DMA copy of `x` (identity compressor kernel)."""
    orig_shape = x.shape
    n = x.size
    if n == 0:
        return x
    itemsize = jnp.dtype(x.dtype).itemsize

    # 2D view [rows, lanes] purely to get a leading axis to chunk along.
    # DMA does not care about lane density, so no padding / lane search is
    # needed; the reshape is metadata-only (contiguous buffer).
    lanes = orig_shape[-1] if len(orig_shape) >= 1 else 1
    lanes = max(int(lanes), 1)
    rows = n // lanes
    x2d = x.reshape(rows, lanes)

    total_bytes = n * itemsize
    num_chunks = max(1, min(_MAX_CHUNKS,
                            pl.cdiv(total_bytes, _TARGET_CHUNK_BYTES),
                            rows))
    chunk_rows = pl.cdiv(rows, num_chunks)
    chunks = []
    r = 0
    while r < rows:
        nr = min(chunk_rows, rows - r)
        chunks.append((r, nr))
        r += nr

    out2d = pl.pallas_call(
        _make_dma_copy_kernel(chunks),
        out_shape=jax.ShapeDtypeStruct((rows, lanes), x.dtype),
        in_specs=[pl.BlockSpec(memory_space=pl.ANY)],
        out_specs=pl.BlockSpec(memory_space=pl.ANY),
        scratch_shapes=[pltpu.SemaphoreType.DMA((len(chunks),))],
        cost_estimate=pl.CostEstimate(
            flops=0, transcendentals=0, bytes_accessed=2 * total_bytes),
    )(x2d)

    return out2d.reshape(orig_shape)


def base_compressor_forward(x, position_ids=None, attention_mask=None, *,
                            force_pallas_copy=False, **kwargs):
    """Pallas implementation of BaseCompressor.forward (identity interface).

    Args:
        x: [batch, seqlen, hidden]
        position_ids: [batch, seqlen] (unused, kept for signature parity)
        attention_mask: [batch, seqlen] (unused, kept for signature parity)
        force_pallas_copy: when False (default) the identity is returned with
            zero HBM traffic; when True the chunked HBM->HBM DMA kernel runs
            (template for concrete compressors).
    Returns:
        [batch, seqlen_compress, hidden] with seqlen_compress == seqlen.
    """
    del position_ids, attention_mask, kwargs  # unused by the abstract base
    if not force_pallas_copy:
        # Identity op: skip the HBM round-trip entirely.
        return x
    return _pallas_identity_copy(x)


if __name__ == "__main__":
    key = jax.random.PRNGKey(0)
    batch, seqlen, hidden = 2, 8, 32

    kx, _ = jax.random.split(key)
    x = jax.random.normal(kx, (batch, seqlen, hidden), dtype=jnp.float32)
    position_ids = jnp.broadcast_to(jnp.arange(seqlen, dtype=jnp.int32),
                                    (batch, seqlen))
    attention_mask = jnp.ones((batch, seqlen), dtype=jnp.int32)

    # Default fast path: identity with zero HBM traffic.
    out_fast = base_compressor_forward(x, position_ids, attention_mask)
    out_fast = jax.block_until_ready(out_fast)

    # Exercise the chunked HBM->HBM DMA kernel once.
    out_kernel = base_compressor_forward(x, position_ids, attention_mask,
                                         force_pallas_copy=True)
    out_kernel = jax.block_until_ready(out_kernel)

    assert out_fast.shape == (batch, seqlen, hidden)
    assert out_kernel.shape == (batch, seqlen, hidden)
    assert out_kernel.dtype == x.dtype
    assert bool(jnp.allclose(out_fast, x)), "identity fast path mismatch"
    assert bool(jnp.allclose(out_kernel, x)), "identity compressor kernel mismatch"

    print("KERNEL_OK")
</pallas_src>

<mosaic_0001>
module attributes {stable_mosaic.version = 11 : i64} {
  func.func @kernel(%arg0: memref<16x32xf32, #tpu.memory_space<any>>, %arg1: memref<16x32xf32, #tpu.memory_space<any>>, %arg2: memref<1x!tpu.dma_semaphore, #tpu.memory_space<semaphore_mem>>) attributes {dimension_semantics = [], scalar_prefetch = 0 : i64, scratch_operands = 1 : i64, tpu.core_type = #tpu.core_type<tc>} {
    %c0_i32 = arith.constant 0 : i32
    %c0_i32_0 = arith.constant 0 : i32
    %c0_i32_1 = arith.constant 0 : i32
    %0 = tpu.memref_slice %arg0[%c0_i32_0, %c0_i32_1] : memref<16x32xf32, #tpu.memory_space<any>> -> memref<16x32xf32, #tpu.memory_space<any>>
    %c0_i32_2 = arith.constant 0 : i32
    %c0_i32_3 = arith.constant 0 : i32
    %1 = tpu.memref_slice %arg1[%c0_i32_2, %c0_i32_3] : memref<16x32xf32, #tpu.memory_space<any>> -> memref<16x32xf32, #tpu.memory_space<any>>
    %2 = tpu.memref_slice %arg2[%c0_i32] : memref<1x!tpu.dma_semaphore, #tpu.memory_space<semaphore_mem>> -> memref<1x!tpu.dma_semaphore, #tpu.memory_space<semaphore_mem>>
    %3 = tpu.memref_squeeze %2 : memref<1x!tpu.dma_semaphore, #tpu.memory_space<semaphore_mem>> -> memref<!tpu.dma_semaphore, #tpu.memory_space<semaphore_mem>>
    tpu.enqueue_dma source(%0 : memref<16x32xf32, #tpu.memory_space<any>>) target(%1 : memref<16x32xf32, #tpu.memory_space<any>>) target_semaphore(%3 : memref<!tpu.dma_semaphore, #tpu.memory_space<semaphore_mem>>)
    %c0_i32_4 = arith.constant 0 : i32
    %c0_i32_5 = arith.constant 0 : i32
    %c0_i32_6 = arith.constant 0 : i32
    %4 = tpu.memref_slice %arg0[%c0_i32_5, %c0_i32_6] : memref<16x32xf32, #tpu.memory_space<any>> -> memref<16x32xf32, #tpu.memory_space<any>>
    %c0_i32_7 = arith.constant 0 : i32
    %c0_i32_8 = arith.constant 0 : i32
    %5 = tpu.memref_slice %arg1[%c0_i32_7, %c0_i32_8] : memref<16x32xf32, #tpu.memory_space<any>> -> memref<16x32xf32, #tpu.memory_space<any>>
    %6 = tpu.memref_slice %arg2[%c0_i32_4] : memref<1x!tpu.dma_semaphore, #tpu.memory_space<semaphore_mem>> -> memref<1x!tpu.dma_semaphore, #tpu.memory_space<semaphore_mem>>
    %7 = tpu.memref_squeeze %6 : memref<1x!tpu.dma_semaphore, #tpu.memory_space<semaphore_mem>> -> memref<!tpu.dma_semaphore, #tpu.memory_space<semaphore_mem>>
    tpu.wait_dma2 semaphore(%7 : memref<!tpu.dma_semaphore, #tpu.memory_space<semaphore_mem>>) src(%4 : memref<16x32xf32, #tpu.memory_space<any>>) dst(%5 : memref<16x32xf32, #tpu.memory_space<any>>)
    return
  }
}

</mosaic_0001>

<bundles_post_ra>
// kernel: tpu_custom_call.1
= control target key start
LH: loop header
LB: loop body
LE: loop exit
PB: predicated region body
PF: predicated region fallthrough
CT: control target
= control target key end

     0   :  { %s32_s12 = smov [#allocation2]   ;;  %s33_s13 = smov [#allocation3]   ;;  %s51_s0 = inlined_call_operand.hbm [shape: f32[16,32], index: 0, kind: input, shape index: {}]   ;;  %s52_s1 = inlined_call_operand.hbm [shape: f32[16,32], index: 1, kind: output, shape index: {}]  }
   0x1   :  { %s10_s8 = sshll.u32 %s51_s0, 4  ;;  %s12_s11 = sshll.u32 %s52_s1, 4  ;;  %s11_s8 = int_to_ptr.hbm [resolvable:$true] %s10_s8  ;;  %s13_s11 = int_to_ptr.hbm [resolvable:$true] %s12_s11 }
   0x2   :  { %s34_s14 = smov 0  }
   0x3   :  { %16 = dma.general %s11_s8, 256, %s13_s11, %s32_s12, %s33_s13, [#allocation4], %s34_s14, 0  }
   0x4   :  { %30 = dma.done.wait [#allocation2], 256 }
   0x5   :  { %31 = vsyncadd [#allocation2], 4294967040 }
   0x6   :  { %20 = vsyncmov [#allocation2] }
   0x9   :  { %s21_s15 = vpop.sfrf %20 }
   0xa   :  { %p26_p0 = scmp.ne.s32.totalorder %s21_s15, 0 }
   0xc   :  { %25 = shalt.err (%p26_p0)  }

</bundles_post_ra>
